<compile_context>
chip_gen: v5e
topology: v5e:2x2
jax: 0.10.0
libtpu: 0.0.40
codegen_flags: <defaults>
</compile_context>

<pallas_src>
import functools
import math

import jax
import jax.numpy as jnp
from jax.experimental import pallas as pl
from jax.experimental.pallas import tpu as pltpu

BN_EPS = 1e-5


def _sw_uniform_bits(shape, salt_u32, lane_pow2_shift):
    """Portable counter-based PRNG fallback (non-TPU backends): one uint32 per element."""
    row = jax.lax.broadcasted_iota(jnp.int32, shape, 0)
    col = jax.lax.broadcasted_iota(jnp.int32, shape, 1)
    lin = jnp.bitwise_or(jnp.left_shift(row, lane_pow2_shift), col).astype(jnp.uint32)
    h = lin + salt_u32
    h = h ^ (h << 13); h = h ^ (h >> 17); h = h ^ (h << 5)
    h = h + jnp.uint32(0x9E3779B9)
    h = h ^ (h << 13); h = h ^ (h >> 17); h = h ^ (h << 5)
    return h


def _linear_bn_silu_dropout_kernel(seed_ref, x_ref, wt_ref, g_ref, beta_ref, o_ref,
                                   *, dropout_p, use_hw_prng):
    # ---- Linear.  Bias intentionally omitted: a per-feature constant cancels exactly in
    #      the batch-mean subtraction of training-mode BatchNorm.  Operands are bf16 at
    #      the MXU, accumulation is f32.  Weight arrives pre-transposed as (Cin, TN), so
    #      this is a standard (M,K)x(K,N) contraction with no per-tile transpose.
    y = jnp.dot(x_ref[...], wt_ref[...], preferred_element_type=jnp.float32)   # (M, TN)

    # ---- BatchNorm1d training forward: single-pass biased batch stats, affine folded
    #      into one scale/shift (two VPU ops per element).
    mean = jnp.mean(y, axis=0, keepdims=True)                                  # (1, TN)
    mean_sq = jnp.mean(y * y, axis=0, keepdims=True)
    var = jnp.maximum(mean_sq - mean * mean, 0.0)
    inv = jax.lax.rsqrt(var + BN_EPS)
    scale = g_ref[...] * inv
    shift = beta_ref[...] - mean * scale
    z = y * scale + shift

    # ---- SiLU: exp and the approx reciprocal both issue on the EUP slot (no VALU divide).
    s = z * pl.reciprocal(1.0 + jnp.exp(-z), approx=True)

    # ---- Inverted dropout; statically removed when p == 0.
    if dropout_p > 0.0:
        thresh = jnp.uint32(min(int(round(dropout_p * 4294967296.0)), 0xFFFFFFFF))
        if use_hw_prng:
            # Hardware PRNG, salted per Cout tile.
            pltpu.prng_seed(seed_ref[0] + pl.program_id(0))
            bits = pltpu.prng_random_bits(o_ref.shape)
            if bits.dtype != jnp.uint32:
                bits = pltpu.bitcast(bits, jnp.uint32)
        else:
            m, tn = o_ref.shape
            lane_shift = max((tn - 1).bit_length(), 1)
            salt = (seed_ref[0].astype(jnp.uint32) * jnp.uint32(2654435761)
                    + (pl.program_id(0).astype(jnp.uint32) + jnp.uint32(1))
                    * jnp.uint32(0x85EBCA6B))
            bits = _sw_uniform_bits((m, tn), salt, lane_shift)
        keep = bits >= thresh                                  # raw 32-bit compare
        s = jnp.where(keep, s * jnp.float32(1.0 / (1.0 - dropout_p)), jnp.float32(0.0))

    o_ref[...] = s.astype(o_ref.dtype)


def my_linear_bn(x, weight, bias, gamma, beta, *, seed=0, dropout_p=0.1,
                 out_dtype=jnp.float32, block_n=128, core_parallel=False,
                 use_hw_prng=None):
    """Fused Linear -> BatchNorm1d(training) -> SiLU -> Dropout.

    x: (..., Cin).  All leading dims are flattened into M, which packs MXU rows
    (MyLinearBN2D/3D call sites give M = B*L) and matches BatchNorm1d per-feature stats
    over every leading dim.  weight: (Cout, Cin) PyTorch layout.  `bias` is accepted for
    API parity with nn.Linear but is mathematically cancelled by the BN batch-mean
    subtraction (training mode), so it is never loaded by the kernel.
    """
    del bias  # cancels exactly under training-mode BN normalization
    lead = x.shape[:-1]
    cin = x.shape[-1]
    m = int(math.prod(lead))
    cout = weight.shape[0]

    # Lane-dense output tiles: pad Cout up to a multiple of 128 (unmasked vst), slice after.
    cout_pad = -(-cout // 128) * 128
    pad = cout_pad - cout
    w = jnp.pad(weight, ((0, pad), (0, 0))) if pad else weight
    g = jnp.pad(gamma, (0, pad), constant_values=1.0) if pad else gamma
    b = jnp.pad(beta, (0, pad)) if pad else beta

    # bf16 operands at the MXU (f32 accumulation in-kernel); one-time weight relayout to
    # (Cin, Cout_pad) so the kernel consumes a standard (K, N) RHS.
    x2 = x.reshape(m, cin).astype(jnp.bfloat16)
    wt = jnp.transpose(w).astype(jnp.bfloat16)
    g2 = g.reshape(1, cout_pad).astype(jnp.float32)
    b2 = b.reshape(1, cout_pad).astype(jnp.float32)

    tn = block_n if (block_n % 128 == 0 and cout_pad % block_n == 0) else 128
    grid_n = cout_pad // tn

    if use_hw_prng is None:
        use_hw_prng = jax.devices()[0].platform == "tpu"

    seed_arr = jnp.asarray([seed], dtype=jnp.int32)
    kernel = functools.partial(_linear_bn_silu_dropout_kernel,
                               dropout_p=float(dropout_p),
                               use_hw_prng=bool(use_hw_prng))

    # Explicit VMEM budget: x is resident (block index invariant across the Cout grid but
    # still double-buffered by default), weight / output tiles double-buffered.  Keeps
    # v5e's 16 MiB scoped default from capping tile size, stays well under v7x's 64 MiB.
    out_bytes = jnp.dtype(out_dtype).itemsize
    need = (2 * m * cin * 2                       # x (bf16)
            + 2 * cin * tn * 2                    # weight tile (bf16)
            + 2 * m * tn * (4 + out_bytes)        # f32 intermediates + out tile
            + 4 * tn * 4                          # gamma / beta tiles
            + (2 << 20))                          # slack
    vmem_limit = int(min(max(need, 16 << 20), 48 << 20))

    # BN stats are per-feature, so Cout tiles are fully independent.  On v7x pass
    # core_parallel=True (and ensure grid_n >= 2) to split the axis across both TCs.
    dim_sem = (pltpu.CORE_PARALLEL,) if core_parallel else ("parallel",)

    grid_spec = pltpu.PrefetchScalarGridSpec(
        num_scalar_prefetch=1,                    # dropout seed lives in SMEM
        grid=(grid_n,),
        in_specs=[
            pl.BlockSpec((m, cin), lambda j, seed: (0, 0)),    # x: whole batch, invariant
            pl.BlockSpec((cin, tn), lambda j, seed: (0, j)),   # bf16 (K, N) weight tile
            pl.BlockSpec((1, tn), lambda j, seed: (0, j)),     # gamma tile
            pl.BlockSpec((1, tn), lambda j, seed: (0, j)),     # beta tile
        ],
        out_specs=pl.BlockSpec((m, tn), lambda j, seed: (0, j)),
    )

    out = pl.pallas_call(
        kernel,
        out_shape=jax.ShapeDtypeStruct((m, cout_pad), out_dtype),
        grid_spec=grid_spec,
        compiler_params=pltpu.CompilerParams(
            dimension_semantics=dim_sem,
            vmem_limit_bytes=vmem_limit,
        ),
    )(seed_arr, x2, wt, g2, b2)

    if pad:
        out = out[:, :cout]
    return out.reshape(*lead, cout)


def _ref_block(x, w, b, g, be):
    """Pure-JAX reference (training-mode BN), mirroring the kernel's bf16 MXU operands."""
    lead = x.shape[:-1]
    xf = x.reshape(-1, x.shape[-1]).astype(jnp.bfloat16).astype(jnp.float32)
    wf = w.astype(jnp.bfloat16).astype(jnp.float32)
    y = xf @ wf.T + b                          # bias included: it must cancel under BN
    mean = y.mean(0)
    var = y.var(0)                             # biased, as BN training normalization uses
    z = (y - mean) / jnp.sqrt(var + BN_EPS) * g + be
    s = z * jax.nn.sigmoid(z)
    return s.reshape(*lead, w.shape[0])


if __name__ == "__main__":
    key = jax.random.PRNGKey(0)
    k1, k2, k3, k4, k5, k6 = jax.random.split(key, 6)

    # --- MyLinearBN1D-style block: (B, Cin) -> (B, Cout) -----------------------------
    B, CIN, COUT = 8, 32, 128
    x1 = jax.random.normal(k1, (B, CIN), jnp.float32)
    bound = 1.0 / math.sqrt(CIN)
    w1 = jax.random.uniform(k2, (COUT, CIN), jnp.float32, -bound, bound)
    b1 = jax.random.uniform(k3, (COUT,), jnp.float32, -bound, bound)
    g1 = jnp.ones((COUT,), jnp.float32)
    be1 = jnp.zeros((COUT,), jnp.float32)

    got1 = my_linear_bn(x1, w1, b1, g1, be1, seed=0, dropout_p=0.0)
    jax.block_until_ready(got1)
    assert got1.shape == (B, COUT)
    err1 = float(jnp.max(jnp.abs(got1 - _ref_block(x1, w1, b1, g1, be1))))
    assert err1 < 2e-2, f"MyLinearBN1D fused kernel mismatch: {err1}"

    # --- MyLinearBN2D-style block: (B, L, Cin) -> (B, L, Cout) ------------------------
    # Leading dims flatten to M = B*L = 128 -> full MXU row occupancy even with a tiny
    # per-sample batch; Cout=32 exercises the lane-dense padding (32 -> 128) path.
    B2, L2, CIN2, COUT2 = 2, 64, 16, 32
    x2 = jax.random.normal(k4, (B2, L2, CIN2), jnp.float32)
    bound2 = 1.0 / math.sqrt(CIN2)
    w2 = jax.random.uniform(k5, (COUT2, CIN2), jnp.float32, -bound2, bound2)
    b2 = jax.random.uniform(k6, (COUT2,), jnp.float32, -bound2, bound2)
    g2 = jnp.ones((COUT2,), jnp.float32)
    be2 = jnp.zeros((COUT2,), jnp.float32)

    got2 = my_linear_bn(x2, w2, b2, g2, be2, seed=0, dropout_p=0.0)
    jax.block_until_ready(got2)
    assert got2.shape == (B2, L2, COUT2)
    err2 = float(jnp.max(jnp.abs(got2 - _ref_block(x2, w2, b2, g2, be2))))
    assert err2 < 2e-2, f"MyLinearBN2D fused kernel mismatch: {err2}"

    # --- full training-mode forward with dropout active -------------------------------
    out1 = my_linear_bn(x1, w1, b1, g1, be1, seed=123, dropout_p=0.1)
    out2 = my_linear_bn(x2, w2, b2, g2, be2, seed=7, dropout_p=0.05)
    jax.block_until_ready((out1, out2))
    assert out1.shape == (B, COUT) and out1.dtype == jnp.float32
    assert out2.shape == (B2, L2, COUT2)
    assert bool(jnp.all(jnp.isfinite(out1))) and bool(jnp.all(jnp.isfinite(out2)))

    print("KERNEL_OK")
</pallas_src>

<mosaic_0001>
module attributes {stable_mosaic.version = 11 : i64} {
  func.func @_linear_bn_silu_dropout_kernel(%arg0: i32, %arg1: memref<1xi32, #tpu.memory_space<smem>>, %arg2: memref<8x32xbf16, #tpu.memory_space<vmem>>, %arg3: memref<32x128xbf16, #tpu.memory_space<vmem>>, %arg4: memref<1x128xf32, #tpu.memory_space<vmem>>, %arg5: memref<1x128xf32, #tpu.memory_space<vmem>>, %arg6: memref<8x128xf32, #tpu.memory_space<vmem>>) attributes {dimension_semantics = [#tpu.dimension_semantics<parallel>], iteration_bounds = array<i64: 1>, scalar_prefetch = 1 : i64, scratch_operands = 0 : i64, tpu.core_type = #tpu.core_type<tc>, window_params = [{pipeline_mode = #tpu.pipeline_mode<synchronous>, transform_indices = @transform_0, window_bounds = array<i64: 8, 32>}, {transform_indices = @transform_1, window_bounds = array<i64: 32, 128>}, {transform_indices = @transform_2, window_bounds = array<i64: 1, 128>}, {transform_indices = @transform_3, window_bounds = array<i64: 1, 128>}, {transform_indices = @transform_4, window_bounds = array<i64: 8, 128>}]} {
    %c0 = arith.constant 0 : index
    %c0_0 = arith.constant 0 : index
    %0 = vector.load %arg2[%c0, %c0_0] : memref<8x32xbf16, #tpu.memory_space<vmem>>, vector<8x32xbf16>
    %c0_1 = arith.constant 0 : index
    %c0_2 = arith.constant 0 : index
    %1 = vector.load %arg3[%c0_1, %c0_2] : memref<32x128xbf16, #tpu.memory_space<vmem>>, vector<32x128xbf16>
    %cst = arith.constant dense<0.000000e+00> : vector<8x128xf32>
    %2 = tpu.matmul %0, %1, %cst {dimension_numbers = #tpu.dot_dimension_numbers<[1], [0], [0], [1], [0, 0, 1, 1], [], []>} : vector<8x32xbf16>, vector<32x128xbf16>, vector<8x128xf32> -> vector<8x128xf32>
    %cst_3 = arith.constant dense<0.000000e+00> : vector<128xf32>
    %3 = vector.multi_reduction <add>, %2, %cst_3 [0] : vector<8x128xf32> to vector<128xf32>
    %4 = vector.shape_cast %3 : vector<128xf32> to vector<1x128xf32>
    %cst_4 = arith.constant 8.000000e+00 : f32
    %5 = vector.broadcast %cst_4 : f32 to vector<1x128xf32>
    %6 = arith.divf %4, %5 : vector<1x128xf32>
    %7 = arith.mulf %2, %2 : vector<8x128xf32>
    %cst_5 = arith.constant dense<0.000000e+00> : vector<128xf32>
    %8 = vector.multi_reduction <add>, %7, %cst_5 [0] : vector<8x128xf32> to vector<128xf32>
    %9 = vector.shape_cast %8 : vector<128xf32> to vector<1x128xf32>
    %cst_6 = arith.constant 8.000000e+00 : f32
    %10 = vector.broadcast %cst_6 : f32 to vector<1x128xf32>
    %11 = arith.divf %9, %10 : vector<1x128xf32>
    %12 = arith.mulf %6, %6 : vector<1x128xf32>
    %13 = arith.subf %11, %12 : vector<1x128xf32>
    %cst_7 = arith.constant 0.000000e+00 : f32
    %14 = vector.broadcast %cst_7 : f32 to vector<1x128xf32>
    %15 = arith.maximumf %13, %14 : vector<1x128xf32>
    %cst_8 = arith.constant 9.99999974E-6 : f32
    %16 = vector.broadcast %cst_8 : f32 to vector<1x128xf32>
    %17 = arith.addf %15, %16 : vector<1x128xf32>
    %18 = math.rsqrt %17 : vector<1x128xf32>
    %c0_9 = arith.constant 0 : index
    %c0_10 = arith.constant 0 : index
    %19 = vector.load %arg4[%c0_9, %c0_10] : memref<1x128xf32, #tpu.memory_space<vmem>>, vector<1x128xf32>
    %20 = arith.mulf %19, %18 : vector<1x128xf32>
    %c0_11 = arith.constant 0 : index
    %c0_12 = arith.constant 0 : index
    %21 = vector.load %arg5[%c0_11, %c0_12] : memref<1x128xf32, #tpu.memory_space<vmem>>, vector<1x128xf32>
    %22 = arith.mulf %6, %20 : vector<1x128xf32>
    %23 = arith.subf %21, %22 : vector<1x128xf32>
    %24 = vector.broadcast %20 : vector<1x128xf32> to vector<8x128xf32>
    %25 = arith.mulf %2, %24 : vector<8x128xf32>
    %26 = vector.broadcast %23 : vector<1x128xf32> to vector<8x128xf32>
    %27 = arith.addf %25, %26 : vector<8x128xf32>
    %cst_13 = arith.constant 0.000000e+00 : f32
    %28 = vector.broadcast %cst_13 : f32 to vector<8x128xf32>
    %29 = arith.subf %28, %27 : vector<8x128xf32>
    %30 = math.exp %29 : vector<8x128xf32>
    %cst_14 = arith.constant 1.000000e+00 : f32
    %31 = vector.broadcast %cst_14 : f32 to vector<8x128xf32>
    %32 = arith.addf %31, %30 : vector<8x128xf32>
    %33 = tpu.reciprocal %32 {approx = true} : vector<8x128xf32> -> vector<8x128xf32>
    %34 = arith.mulf %27, %33 : vector<8x128xf32>
    %c0_15 = arith.constant 0 : index
    %c0_16 = arith.constant 0 : index
    %35 = vector.load %arg6[%c0_15, %c0_16] : memref<8x128xf32, #tpu.memory_space<vmem>>, vector<8x128xf32>
    tpu.vector_store %arg6[%c0_15, %c0_16], %34 {strides = array<i32>} : memref<8x128xf32, #tpu.memory_space<vmem>>, vector<8x128xf32>,
    return
  }
  func.func @transform_0(%arg0: i32, %arg1: memref<1xi32, #tpu.memory_space<smem>>) -> (i32, i32) {
    %c0_i32 = arith.constant 0 : i32
    %c0_i32_0 = arith.constant 0 : i32
    %c0_i32_1 = arith.constant 0 : i32
    return %c0_i32, %c0_i32_0 : i32, i32
  }
  func.func @transform_1(%arg0: i32, %arg1: memref<1xi32, #tpu.memory_space<smem>>) -> (i32, i32) {
    %c0_i32 = arith.constant 0 : i32
    %c0_i32_0 = arith.constant 0 : i32
    return %c0_i32, %arg0 : i32, i32
  }
  func.func @transform_2(%arg0: i32, %arg1: memref<1xi32, #tpu.memory_space<smem>>) -> (i32, i32) {
    %c0_i32 = arith.constant 0 : i32
    %c0_i32_0 = arith.constant 0 : i32
    return %c0_i32, %arg0 : i32, i32
  }
  func.func @transform_3(%arg0: i32, %arg1: memref<1xi32, #tpu.memory_space<smem>>) -> (i32, i32) {
    %c0_i32 = arith.constant 0 : i32
    %c0_i32_0 = arith.constant 0 : i32
    return %c0_i32, %arg0 : i32, i32
  }
  func.func @transform_4(%arg0: i32, %arg1: memref<1xi32, #tpu.memory_space<smem>>) -> (i32, i32) {
    %c0_i32 = arith.constant 0 : i32
    %c0_i32_0 = arith.constant 0 : i32
    return %c0_i32, %arg0 : i32, i32
  }
}

</mosaic_0001>

<bundles_post_ra>
// kernel: tpu_custom_call.1
= control target key start
LH: loop header
LB: loop body
LE: loop exit
PB: predicated region body
PF: predicated region fallthrough
CT: control target
= control target key end

     0   :  { %11 = vsyncpa [#allocation5], 0  ;;  %s313_s0 = inlined_call_operand.<no memory space> [shape: s32[1], index: 0, kind: input, shape index: {}]   ;;  %s314_s1 = inlined_call_operand.hbm [shape: bf16[8,32], index: 1, kind: input, shape index: {}]   ;;  %s315_s2 = inlined_call_operand.hbm [shape: bf16[32,128], index: 2, kind: input, shape index: {}]   ;;  %s316_s3 = inlined_call_operand.vmem [shape: f32[1,128], index: 3, kind: input, shape index: {}]   ;;  %s317_s4 = inlined_call_operand.vmem [shape: f32[1,128], index: 4, kind: input, shape index: {}]   ;;  %s318_s5 = inlined_call_operand.hbm [shape: f32[8,128], index: 5, kind: output, shape index: {}]  }
   0x1   :  { %12 = vsyncpa [#allocation8], 0 }
   0x2   :  { %13 = vsyncpa [#allocation6], 0  ;;  %s19_s19 = sshll.u32 %s314_s1, 4  ;;  %s262_s20 = smov [#allocation4]   ;;  %s20_s19 = int_to_ptr.hbm [resolvable:$true] %s19_s19 }
   0x3   :  { %s21_s21 = sshll.u32 %s262_s20, 4  ;;  %s29_s24 = sshll.u32 %s315_s2, 4  ;;  %s22_s21 = int_to_ptr.vmem [resolvable:$true] %s21_s21  ;;  %s30_s24 = int_to_ptr.hbm [resolvable:$true] %s29_s24 }
   0x4   :  { %24 = dma.hbm_to_vmem [thread:$0]  %s20_s19, 64, %s22_s21, [#allocation5]  }
   0x5   :  { %s263_s25 = smov [#allocation7]   ;;  %s264_s27 = smov 64  }
   0x6   :  { %s31_s26 = sshll.u32 %s263_s25, 4  ;;  %s265_s28 = smov 4   ;;  %s32_s26 = int_to_ptr.vmem [resolvable:$true] %s31_s26 }
   0x7   :  { %37 = dma.hbm_to_vmem [thread:$0]  %s30_s24, 256, %s32_s26, [#allocation8], %s264_s27, %s264_s27, %s265_s28  }
   0x8   :  { %256 = dma.done.wait [#allocation5], 64  }
   0x9   :  { %257 = vsyncadd [#allocation5], 4294967232 }
   0xa   :  { %258 = dma.done.wait [#allocation8], 256  }
   0xb   :  { %259 = vsyncadd [#allocation8], 4294967040  ;;  %v169_v0 = vld [vmem:[#allocation7 + $0x8] sm:$0xff]  ;;  %v168_v1 = vld [vmem:[#allocation7] sm:$0xff]  ;;  %vm68_vm0 = vcmask 261120   ;;  %v266_v3 = vmov 8.0  }
   0xc   :  { %78 = vmatpush.bf16.msra.mxu0 %v169_v0  ;;  %v51_v2 = vld [vmem:[#allocation4] sm:$0xf]  ;;  %176 = vrcp.f32 %v266_v3  ;;  %s148_s9 = sshll.u32 %s318_s5, 4  ;;  %s149_s9 = int_to_ptr.hbm [resolvable:$true] %s148_s9 }
   0xd   :  { %v121_v37 = vld [vmem:[%s316_s3] sm:$0x1]  ;;  %s267_s3 = smov [#allocation9]  }
   0xe   :  { %v123_v40 = vld [vmem:[%s317_s4] sm:$0x1]  ;;  %s146_s6 = sshll.u32 %s267_s3, 4  ;;  %s147_s6 = int_to_ptr.vmem [resolvable:$true] %s146_s6 }
  0x10   :  { %79 = vmatpush.bf16.msra.mxu0 %v168_v1 }
  0x12   :  { %v177_v4 = vpop.eup %176 }
  0x13   :  { %167 = vmatmul.msk.bf16.vlgmr.msra.gmra.mxu0 %vm68_vm0, %v51_v2  ;;  %v92_v5 = vmul.f32 8.0, %v177_v4  ;;  %vm96_vm1 = vweird.f32 %v177_v4 }
  0x15   :  { %v93_v6 = vsub.f32 1.0, %v92_v5 }
  0x17   :  { %v94_v10 = vmul.f32 %v177_v4, %v93_v6 }
  0x19   :  { %v95_v15 = vadd.f32 %v177_v4, %v94_v10 }
  0x1b   :  { %v97_v21 = vsel %vm96_vm1, %v177_v4, %v95_v15 }
  0x90   :  { %v81_v7 = vpop.f32.mrf.mxu0 }
  0x91   :  { %v85_v8 = vrot.slane %v81_v7, 4  ;;  %v99_v9 = vmul.f32 %v81_v7, %v81_v7 }
  0x93   :  { %v86_v11 = vadd.f32 %v85_v8, %v81_v7  ;;  %v100_v12 = vrot.slane %v99_v9, 4 }
  0x95   :  { %v87_v13 = vrot.slane %v86_v11, 2  ;;  %v101_v14 = vadd.f32 %v100_v12, %v99_v9 }
  0x97   :  { %v88_v16 = vadd.f32 %v87_v13, %v86_v11  ;;  %v102_v17 = vrot.slane %v101_v14, 2 }
  0x98   :  { %v83_v18 = vpop.f32.mrf.mxu0 }
  0x99   :  { %v89_v19 = vrot.slane %v88_v16, 1  ;;  %v103_v20 = vadd.f32 %v102_v17, %v101_v14 }
  0x9b   :  { %v90_v22 = vadd.f32 %v89_v19, %v88_v16  ;;  %v104_v23 = vrot.slane %v103_v20, 1 }
  0x9d   :  { %v98_v24 = vmul.f32 %v97_v21, %v90_v22  ;;  %v105_v25 = vadd.f32 %v104_v23, %v103_v20 }
  0x9f   :  { %v106_v26 = vmul.f32 %v105_v25, %v97_v21  ;;  %v107_v27 = vmul.f32 %v98_v24, %v98_v24 }
  0xa1   :  { %v108_v28 = vsub.f32 %v106_v26, %v107_v27 }
  0xa3   :  { %v109_v29 = vmax.f32 %v108_v28, 0.0 }
  0xa5   :  { %v110_v30 = vadd.f32 1e-05, %v109_v29 }
  0xa7   :  { %178 = vrsqrt.f32 %v110_v30  ;;  %vm117_vm3 = vweird.f32 %v110_v30 }
  0xad   :  { %v179_v31 = vpop.eup %178 }
  0xae   :  { %v112_v32 = vmul.f32 %v179_v31, %v110_v30  ;;  %vm118_vm2 = vweird.f32 %v179_v31 }
  0xaf   :  { %vm119_vm4 = vmor %vm117_vm3, %vm118_vm2 }
  0xb0   :  { %v113_v33 = vmul.f32 %v179_v31, %v112_v32 }
  0xb2   :  { %v114_v34 = vmul.f32 0.5, %v113_v33 }
  0xb4   :  { %v115_v35 = vsub.f32 1.5, %v114_v34 }
  0xb6   :  { %v116_v36 = vmul.f32 %v179_v31, %v115_v35 }
  0xb8   :  { %v120_v38 = vsel %vm119_vm4, %v179_v31, %v116_v36 }
  0xb9   :  { %v122_v39 = vmul.f32 %v121_v37, %v120_v38 }
  0xbb   :  { %v124_v41 = vmul.f32 %v122_v39, %v98_v24  ;;  %v127_v42 = vperm.slane %v122_v39, 0 }
  0xbd   :  { %v125_v43 = vsub.f32 %v123_v40, %v124_v41  ;;  %v129_v44 = vmul.f32 %v127_v42, %v81_v7 }
  0xbf   :  { %v131_v45 = vperm.slane %v125_v43, 0 }
  0xc1   :  { %v133_v46 = vadd.f32 %v131_v45, %v129_v44 }
  0xc3   :  { %v134_v47 = vsub.f32 0.0, %v133_v46 }
  0xc5   :  { %v135_v48 = vmul.f32 1.442695, %v134_v47 }
  0xc7   :  { %180 = vpow2.f32 %v135_v48 }
  0xcd   :  { %v181_v49 = vpop.eup %180 }
  0xce   :  { %v137_v50 = vadd.f32 1.0, %v181_v49 }
  0xd0   :  { %182 = vrcp.f32 %v137_v50 }
  0xd6   :  { %v183_v51 = vpop.eup %182 }
  0xd7   :  { %v139_v52 = vmul.f32 %v183_v51, %v133_v46 }
  0xd9   :  { %140 = vst [vmem:[#allocation9] sm:$0xff] %v139_v52 }
  0xda   :  { %151 = dma.vmem_to_hbm [thread:$0]  %s147_s6, 128, %s149_s9, [#allocation6]  }
  0xdb   :  { %260 = dma.done.wait [#allocation6], 128  }
  0xdc   :  { %261 = vsyncadd [#allocation6], 4294967168 }
  0xdd   :  { %156 = vsyncpa [#allocation5], 1 }
  0xde   :  { %157 = vsyncpa [#allocation8], 1 }
  0xdf   :  { %158 = vsyncpa [#allocation6], 1 }

</bundles_post_ra>
